<compile_context>
chip_gen: v5e
topology: v5e:2x2
jax: 0.10.0
libtpu: 0.0.40
codegen_flags: <defaults>
</compile_context>

<pallas_src>
import math

import jax
import jax.numpy as jnp
from jax.experimental import pallas as pl
from jax.experimental.pallas import tpu as pltpu


# ----------------------------------------------------------------------------
# Hardware-dependent knobs
# ----------------------------------------------------------------------------
def _vmem_limit_bytes():
    cap = 128 * 1024 * 1024
    try:
        cap = int(pltpu.get_tpu_info().vmem_capacity_bytes)
    except Exception:
        pass
    # Leave headroom for compiler scratch/semaphores: ~3/4 of physical VMEM
    # (v7x 64 MiB -> 48 MiB, v5e/v6e 128 MiB -> 96 MiB).
    return max(32 * 1024 * 1024, (cap * 3) // 4)


def _pick_tq(seq_len):
    kind = ""
    try:
        kind = jax.devices()[0].device_kind.lower()
    except Exception:
        pass
    # v6e: 256-wide MXU + 128 MiB VMEM -> 256.  v5e (128-wide MXU) and
    # v7x (64 MiB VMEM) -> 128.
    pref = 256 if "v6" in kind else 128
    if seq_len <= pref:
        return seq_len
    tq = pref
    while tq >= 8 and seq_len % tq != 0:
        tq //= 2
    return tq if (tq >= 8 and seq_len % tq == 0) else seq_len


# Weights are grid-invariant: single-buffer them (double buffering buys nothing
# and doubles resident VMEM).
_WEIGHT_PIPE = {"pipeline_mode": pl.Buffered(1)} if hasattr(pl, "Buffered") else {}


def _resident_spec(w):
    return pl.BlockSpec(w.shape, lambda *_, nd=w.ndim: (0,) * nd, **_WEIGHT_PIPE)


# ----------------------------------------------------------------------------
# Shared in-kernel helpers
# ----------------------------------------------------------------------------
def _layer_norm(v, g, b, hidden, eps=1e-6):
    # bert-pytorch LayerNorm: unbiased std (torch.std default, N-1 denominator)
    mean = jnp.mean(v, axis=-1, keepdims=True)
    d = v - mean
    var = jnp.sum(d * d, axis=-1, keepdims=True) * (1.0 / (hidden - 1))
    inv = pl.reciprocal(jnp.sqrt(var) + eps, approx=True)
    return g * d * inv + b


# ----------------------------------------------------------------------------
# Pallas kernel 1: LN1 + fused K/V projection, grid = (batch, seq-tile)
# ----------------------------------------------------------------------------
def _make_kv_kernel(hidden):
    def kernel(x_ref, wkv_ref, bkv_ref, g1_ref, beta1_ref, k_ref, v_ref):
        xn = _layer_norm(x_ref[0], g1_ref[...], beta1_ref[...], hidden)
        kv = jnp.dot(xn.astype(jnp.bfloat16), wkv_ref[...],
                     preferred_element_type=jnp.float32) + bkv_ref[...]
        k_ref[0] = kv[:, :hidden].astype(jnp.bfloat16)
        v_ref[0] = kv[:, hidden:].astype(jnp.bfloat16)
    return kernel


# ----------------------------------------------------------------------------
# Pallas kernel 2: attention (per query tile) + residual + FFN + residual
# grid = (batch, query-tile); no cross-iteration state -> both axes parallel
# ----------------------------------------------------------------------------
def _make_block_kernel(num_heads, seq_len, hidden, tq):
    nh = num_heads
    dk = hidden // nh
    scale = 1.0 / math.sqrt(dk)
    gelu_c = math.sqrt(2.0 / math.pi)

    def kernel(x_ref, mask_ref, k_ref, v_ref,
               wq_ref, bq_ref, wo_ref, bo_ref,
               w1_ref, b1_ref, w2_ref, b2_ref,
               g1_ref, beta1_ref, g2_ref, beta2_ref,
               o_ref):
        x_t = x_ref[0]                                      # (tq, H) f32
        bias = mask_ref[0]                                  # (1, S) additive mask
        k = k_ref[0]                                        # (S, H) bf16
        v = v_ref[0]                                        # (S, H) bf16

        # ---- attention sublayer (pre-norm); Q for this tile only ------------
        xn1 = _layer_norm(x_t, g1_ref[...], beta1_ref[...], hidden)
        q = jnp.dot(xn1.astype(jnp.bfloat16), wq_ref[...],
                    preferred_element_type=jnp.float32) + bq_ref[...]
        q = (q * scale).astype(jnp.bfloat16)                # (tq, H)

        # Per-head accumulation: acc stays (tq, H); only one (tq, S)
        # score/softmax block is live at a time, and the (nh, tq, H)
        # projection intermediate never exists.
        attn = jnp.zeros((tq, hidden), jnp.float32)
        for h in range(nh):                                 # static head loop
            lo = h * dk
            s = jnp.einsum('qd,kd->qk', q[:, lo:lo + dk], k[:, lo:lo + dk],
                           preferred_element_type=jnp.float32) + bias
            m = jnp.max(s, axis=-1, keepdims=True)
            e = jnp.exp(s - m)
            p = e * pl.reciprocal(jnp.sum(e, axis=-1, keepdims=True),
                                  approx=True)
            ctx = jnp.dot(p.astype(jnp.bfloat16), v[:, lo:lo + dk],
                          preferred_element_type=jnp.float32)      # (tq, dk)
            attn = attn + jnp.dot(ctx.astype(jnp.bfloat16),
                                  wo_ref[lo:lo + dk, :],
                                  preferred_element_type=jnp.float32)
        x_t = x_t + attn + bo_ref[...]

        # ---- feed-forward sublayer (pre-norm) --------------------------------
        xn2 = _layer_norm(x_t, g2_ref[...], beta2_ref[...], hidden)
        hdn = jnp.dot(xn2.astype(jnp.bfloat16), w1_ref[...],
                      preferred_element_type=jnp.float32) + b1_ref[...]
        # GELU (tanh approximation, as in bert-pytorch); cube kept on VALU.
        hdn = 0.5 * hdn * (1.0 + jnp.tanh(
            gelu_c * (hdn + 0.044715 * hdn * hdn * hdn)))
        ff = jnp.dot(hdn.astype(jnp.bfloat16), w2_ref[...],
                     preferred_element_type=jnp.float32) + b2_ref[...]

        # TODO(synk): dropout layers (embedding/attention/sublayer/block) are
        # identity here (eval-mode semantics).
        o_ref[0] = (x_t + ff).astype(o_ref.dtype)

    return kernel


# ----------------------------------------------------------------------------
# One transformer block = two pallas_calls (K/V projection, then attention+FFN)
# ----------------------------------------------------------------------------
def transformer_block_pallas(x, mask_bias, lp, num_heads, tq=None):
    """x: [B, S, H] f32, mask_bias: [B, 1, S] f32 additive, lp: layer params."""
    B, S, H = x.shape
    if tq is None:
        tq = _pick_tq(S)
    assert S % tq == 0 and (tq == S or tq % 8 == 0)
    nq = S // tq

    cparams = pltpu.CompilerParams(
        dimension_semantics=("parallel", "parallel"),
        vmem_limit_bytes=_vmem_limit_bytes())

    # ---- pass 1: K/V projection (LN1 + fused matmul), lane-dense bf16 --------
    kv_weights = (lp["wkv"], lp["bkv"], lp["ln1_g"], lp["ln1_b"])
    kv_in_specs = [pl.BlockSpec((1, tq, H), lambda b, q: (b, q, 0))]
    kv_in_specs += [_resident_spec(w) for w in kv_weights]
    k, v = pl.pallas_call(
        _make_kv_kernel(H),
        out_shape=(jax.ShapeDtypeStruct((B, S, H), jnp.bfloat16),
                   jax.ShapeDtypeStruct((B, S, H), jnp.bfloat16)),
        grid=(B, nq),
        in_specs=kv_in_specs,
        out_specs=(pl.BlockSpec((1, tq, H), lambda b, q: (b, q, 0)),
                   pl.BlockSpec((1, tq, H), lambda b, q: (b, q, 0))),
        compiler_params=cparams,
    )(x, *kv_weights)

    # ---- pass 2: per-query-tile attention + FFN ------------------------------
    blk_weights = (lp["wq"], lp["bq"], lp["wo"], lp["bo"],
                   lp["w1"], lp["b1"], lp["w2"], lp["b2"],
                   lp["ln1_g"], lp["ln1_b"], lp["ln2_g"], lp["ln2_b"])
    in_specs = [
        pl.BlockSpec((1, tq, H), lambda b, q: (b, q, 0)),   # residual tile
        pl.BlockSpec((1, 1, S), lambda b, q: (b, 0, 0)),    # additive key mask
        pl.BlockSpec((1, S, H), lambda b, q: (b, 0, 0)),    # K (full seq, bf16)
        pl.BlockSpec((1, S, H), lambda b, q: (b, 0, 0)),    # V (full seq, bf16)
    ]
    in_specs += [_resident_spec(w) for w in blk_weights]

    return pl.pallas_call(
        _make_block_kernel(num_heads, S, H, tq),
        out_shape=jax.ShapeDtypeStruct((B, S, H), jnp.float32),
        grid=(B, nq),
        in_specs=in_specs,
        out_specs=pl.BlockSpec((1, tq, H), lambda b, q: (b, q, 0)),
        compiler_params=cparams,
    )(x, mask_bias, k, v, *blk_weights)


# ----------------------------------------------------------------------------
# Plain-JAX glue: embeddings + parameter init / preparation
# ----------------------------------------------------------------------------
def sinusoidal_pe(max_len, d_model):
    position = jnp.arange(max_len, dtype=jnp.float32)[:, None]
    div_term = jnp.exp(jnp.arange(0, d_model, 2, dtype=jnp.float32)
                       * -(math.log(10000.0) / d_model))
    pe = jnp.zeros((max_len, d_model), dtype=jnp.float32)
    pe = pe.at[:, 0::2].set(jnp.sin(position * div_term))
    pe = pe.at[:, 1::2].set(jnp.cos(position * div_term))
    return pe


def init_params(key, vocab_size, hidden, n_layers, max_len=512):
    d_ff = hidden * 4
    keys = jax.random.split(key, 2 + n_layers)

    tok_emb = 0.02 * jax.random.normal(keys[0], (vocab_size, hidden), jnp.float32)
    tok_emb = tok_emb.at[0].set(0.0)      # padding_idx=0
    seg_emb = 0.02 * jax.random.normal(keys[1], (3, hidden), jnp.float32)
    seg_emb = seg_emb.at[0].set(0.0)      # padding_idx=0
    pe = sinusoidal_pe(max_len, hidden)

    layers = []
    for li in range(n_layers):
        lk = jax.random.split(keys[2 + li], 6)
        p = {
            "wq": 0.02 * jax.random.normal(lk[0], (hidden, hidden), jnp.float32),
            "bq": jnp.zeros((1, hidden), jnp.float32),
            "wk": 0.02 * jax.random.normal(lk[1], (hidden, hidden), jnp.float32),
            "bk": jnp.zeros((1, hidden), jnp.float32),
            "wv": 0.02 * jax.random.normal(lk[2], (hidden, hidden), jnp.float32),
            "bv": jnp.zeros((1, hidden), jnp.float32),
            "wo": 0.02 * jax.random.normal(lk[3], (hidden, hidden), jnp.float32),
            "bo": jnp.zeros((1, hidden), jnp.float32),
            "w1": 0.02 * jax.random.normal(lk[4], (hidden, d_ff), jnp.float32),
            "b1": jnp.zeros((1, d_ff), jnp.float32),
            "w2": 0.02 * jax.random.normal(lk[5], (d_ff, hidden), jnp.float32),
            "b2": jnp.zeros((1, hidden), jnp.float32),
            "ln1_g": jnp.ones((1, hidden), jnp.float32),
            "ln1_b": jnp.zeros((1, hidden), jnp.float32),
            "ln2_g": jnp.ones((1, hidden), jnp.float32),
            "ln2_b": jnp.zeros((1, hidden), jnp.float32),
        }
        layers.append(p)
    return {"tok_emb": tok_emb, "seg_emb": seg_emb, "pe": pe, "layers": layers}


def prepare_layer(p, num_heads):
    """Fuse K/V weights and cast matmul weights to bf16 (f32 biases / LN)."""
    # TODO(synk): optional fp8 cast of w1/w2 on v7x (2x MXU, half VMEM) is not
    # enabled here to keep bit-compatible bf16 accuracy.
    return {
        "wq": p["wq"].astype(jnp.bfloat16),
        "bq": p["bq"],
        "wkv": jnp.concatenate([p["wk"], p["wv"]], axis=1).astype(jnp.bfloat16),
        "bkv": jnp.concatenate([p["bk"], p["bv"]], axis=1),     # (1, 2H) f32
        "wo": p["wo"].astype(jnp.bfloat16),
        "bo": p["bo"],
        "w1": p["w1"].astype(jnp.bfloat16),
        "b1": p["b1"],
        "w2": p["w2"].astype(jnp.bfloat16),
        "b2": p["b2"],
        "ln1_g": p["ln1_g"], "ln1_b": p["ln1_b"],
        "ln2_g": p["ln2_g"], "ln2_b": p["ln2_b"],
    }


def bert_forward(tokens, segments, params, num_heads):
    B, S = tokens.shape
    # additive key bias: 0 where token > 0, -1e9 otherwise ([B, 1, S])
    mask_bias = jnp.where(tokens > 0, 0.0, -1e9).astype(jnp.float32)[:, None, :]

    # BERTEmbedding: token + positional (sinusoidal) + segment (dropout = id)
    x = (params["tok_emb"][tokens]
         + params["pe"][:S][None, :, :]
         + params["seg_emb"][segments]).astype(jnp.float32)

    for lp in params["layers"]:
        x = transformer_block_pallas(x, mask_bias, lp, num_heads)
    return x


# ----------------------------------------------------------------------------
if __name__ == "__main__":
    B, S = 2, 8
    hidden = 32
    n_layers = 2
    attn_heads = 4
    vocab_size = 32

    key = jax.random.PRNGKey(0)
    k_tok, k_seg, k_par = jax.random.split(key, 3)

    tokens = jax.random.randint(k_tok, (B, S), 0, vocab_size, dtype=jnp.int32)
    segments = jnp.where(tokens > 0,
                         jax.random.randint(k_seg, (B, S), 1, 3, dtype=jnp.int32),
                         0)

    raw = init_params(k_par, vocab_size, hidden, n_layers)
    params = {
        "tok_emb": raw["tok_emb"],
        "seg_emb": raw["seg_emb"],
        "pe": raw["pe"],
        "layers": [prepare_layer(p, attn_heads) for p in raw["layers"]],
    }

    out = bert_forward(tokens, segments, params, attn_heads)
    out = jax.block_until_ready(out)
    assert out.shape == (B, S, hidden)
    assert bool(jnp.all(jnp.isfinite(out)))
    print("KERNEL_OK")
</pallas_src>

<mosaic_0001>
module attributes {stable_mosaic.version = 11 : i64} {
  func.func @kernel(%arg0: i32, %arg1: i32, %arg2: memref<1x8x32xf32, #tpu.memory_space<vmem>>, %arg3: memref<32x64xbf16, #tpu.memory_space<vmem>>, %arg4: memref<1x64xf32, #tpu.memory_space<vmem>>, %arg5: memref<1x32xf32, #tpu.memory_space<vmem>>, %arg6: memref<1x32xf32, #tpu.memory_space<vmem>>, %arg7: memref<1x8x32xbf16, #tpu.memory_space<vmem>>, %arg8: memref<1x8x32xbf16, #tpu.memory_space<vmem>>) attributes {dimension_semantics = [#tpu.dimension_semantics<parallel>, #tpu.dimension_semantics<parallel>], iteration_bounds = array<i64: 2, 1>, scalar_prefetch = 0 : i64, scratch_operands = 0 : i64, tpu.core_type = #tpu.core_type<tc>, window_params = [{transform_indices = @transform_0, window_bounds = array<i64: 1, 8, 32>}, {pipeline_mode = #tpu.pipeline_mode<synchronous>, transform_indices = @transform_1, window_bounds = array<i64: 32, 64>}, {pipeline_mode = #tpu.pipeline_mode<synchronous>, transform_indices = @transform_2, window_bounds = array<i64: 1, 64>}, {pipeline_mode = #tpu.pipeline_mode<synchronous>, transform_indices = @transform_3, window_bounds = array<i64: 1, 32>}, {pipeline_mode = #tpu.pipeline_mode<synchronous>, transform_indices = @transform_4, window_bounds = array<i64: 1, 32>}, {transform_indices = @transform_5, window_bounds = array<i64: 1, 8, 32>}, {transform_indices = @transform_6, window_bounds = array<i64: 1, 8, 32>}]} {
    %c0 = arith.constant 0 : index
    %c0_0 = arith.constant 0 : index
    %c0_1 = arith.constant 0 : index
    %0 = vector.load %arg2[%c0, %c0_0, %c0_1] : memref<1x8x32xf32, #tpu.memory_space<vmem>>, vector<1x8x32xf32>
    %1 = vector.shape_cast %0 : vector<1x8x32xf32> to vector<8x32xf32>
    %c0_2 = arith.constant 0 : index
    %c0_3 = arith.constant 0 : index
    %2 = vector.load %arg5[%c0_2, %c0_3] : memref<1x32xf32, #tpu.memory_space<vmem>>, vector<1x32xf32>
    %c0_4 = arith.constant 0 : index
    %c0_5 = arith.constant 0 : index
    %3 = vector.load %arg6[%c0_4, %c0_5] : memref<1x32xf32, #tpu.memory_space<vmem>>, vector<1x32xf32>
    %cst = arith.constant dense<0.000000e+00> : vector<8xf32>
    %4 = vector.multi_reduction <add>, %1, %cst [1] : vector<8x32xf32> to vector<8xf32>
    %5 = vector.shape_cast %4 : vector<8xf32> to vector<8x1xf32>
    %cst_6 = arith.constant 3.200000e+01 : f32
    %6 = vector.broadcast %cst_6 : f32 to vector<8x1xf32>
    %7 = arith.divf %5, %6 : vector<8x1xf32>
    %8 = vector.broadcast %7 : vector<8x1xf32> to vector<8x32xf32>
    %9 = arith.subf %1, %8 : vector<8x32xf32>
    %10 = arith.mulf %9, %9 : vector<8x32xf32>
    %cst_7 = arith.constant dense<0.000000e+00> : vector<8xf32>
    %11 = vector.multi_reduction <add>, %10, %cst_7 [1] : vector<8x32xf32> to vector<8xf32>
    %12 = vector.shape_cast %11 : vector<8xf32> to vector<8x1xf32>
    %cst_8 = arith.constant 0.0322580636 : f32
    %13 = vector.broadcast %cst_8 : f32 to vector<8x1xf32>
    %14 = arith.mulf %12, %13 : vector<8x1xf32>
    %15 = math.sqrt %14 : vector<8x1xf32>
    %cst_9 = arith.constant 9.99999997E-7 : f32
    %16 = vector.broadcast %cst_9 : f32 to vector<8x1xf32>
    %17 = arith.addf %15, %16 : vector<8x1xf32>
    %18 = tpu.reciprocal %17 {approx = true} : vector<8x1xf32> -> vector<8x1xf32>
    %19 = vector.broadcast %2 : vector<1x32xf32> to vector<8x32xf32>
    %20 = arith.mulf %19, %9 : vector<8x32xf32>
    %21 = vector.broadcast %18 : vector<8x1xf32> to vector<8x32xf32>
    %22 = arith.mulf %20, %21 : vector<8x32xf32>
    %23 = vector.broadcast %3 : vector<1x32xf32> to vector<8x32xf32>
    %24 = arith.addf %22, %23 : vector<8x32xf32>
    %25 = arith.truncf %24 : vector<8x32xf32> to vector<8x32xbf16>
    %c0_10 = arith.constant 0 : index
    %c0_11 = arith.constant 0 : index
    %26 = vector.load %arg3[%c0_10, %c0_11] : memref<32x64xbf16, #tpu.memory_space<vmem>>, vector<32x64xbf16>
    %cst_12 = arith.constant dense<0.000000e+00> : vector<8x64xf32>
    %27 = tpu.matmul %25, %26, %cst_12 {dimension_numbers = #tpu.dot_dimension_numbers<[1], [0], [0], [1], [0, 0, 1, 1], [], []>} : vector<8x32xbf16>, vector<32x64xbf16>, vector<8x64xf32> -> vector<8x64xf32>
    %c0_13 = arith.constant 0 : index
    %c0_14 = arith.constant 0 : index
    %28 = vector.load %arg4[%c0_13, %c0_14] : memref<1x64xf32, #tpu.memory_space<vmem>>, vector<1x64xf32>
    %29 = vector.broadcast %28 : vector<1x64xf32> to vector<8x64xf32>
    %30 = arith.addf %27, %29 : vector<8x64xf32>
    %31 = vector.extract_strided_slice %30 {offsets = [0, 0], sizes = [8, 32], strides = [1, 1]} : vector<8x64xf32> to vector<8x32xf32>
    %32 = arith.truncf %31 : vector<8x32xf32> to vector<8x32xbf16>
    %c0_15 = arith.constant 0 : index
    %c0_16 = arith.constant 0 : index
    %c0_17 = arith.constant 0 : index
    %33 = vector.load %arg7[%c0_15, %c0_16, %c0_17] : memref<1x8x32xbf16, #tpu.memory_space<vmem>>, vector<1x8x32xbf16>
    %34 = vector.shape_cast %33 : vector<1x8x32xbf16> to vector<8x32xbf16>
    %35 = vector.shape_cast %32 : vector<8x32xbf16> to vector<1x8x32xbf16>
    tpu.vector_store %arg7[%c0_15, %c0_16, %c0_17], %35 {strides = array<i32>} : memref<1x8x32xbf16, #tpu.memory_space<vmem>>, vector<1x8x32xbf16>,
    %36 = vector.extract_strided_slice %30 {offsets = [0, 32], sizes = [8, 32], strides = [1, 1]} : vector<8x64xf32> to vector<8x32xf32>
    %37 = arith.truncf %36 : vector<8x32xf32> to vector<8x32xbf16>
    %c0_18 = arith.constant 0 : index
    %c0_19 = arith.constant 0 : index
    %c0_20 = arith.constant 0 : index
    %38 = vector.load %arg8[%c0_18, %c0_19, %c0_20] : memref<1x8x32xbf16, #tpu.memory_space<vmem>>, vector<1x8x32xbf16>
    %39 = vector.shape_cast %38 : vector<1x8x32xbf16> to vector<8x32xbf16>
    %40 = vector.shape_cast %37 : vector<8x32xbf16> to vector<1x8x32xbf16>
    tpu.vector_store %arg8[%c0_18, %c0_19, %c0_20], %40 {strides = array<i32>} : memref<1x8x32xbf16, #tpu.memory_space<vmem>>, vector<1x8x32xbf16>,
    return
  }
  func.func @transform_0(%arg0: i32, %arg1: i32) -> (i32, i32, i32) {
    %c0_i32 = arith.constant 0 : i32
    %c0_i32_0 = arith.constant 0 : i32
    return %arg0, %arg1, %c0_i32 : i32, i32, i32
  }
  func.func @transform_1(%arg0: i32, %arg1: i32) -> (i32, i32) {
    %c0_i32 = arith.constant 0 : i32
    %c0_i32_0 = arith.constant 0 : i32
    %c0_i32_1 = arith.constant 0 : i32
    return %c0_i32, %c0_i32_0 : i32, i32
  }
  func.func @transform_2(%arg0: i32, %arg1: i32) -> (i32, i32) {
    %c0_i32 = arith.constant 0 : i32
    %c0_i32_0 = arith.constant 0 : i32
    %c0_i32_1 = arith.constant 0 : i32
    return %c0_i32, %c0_i32_0 : i32, i32
  }
  func.func @transform_3(%arg0: i32, %arg1: i32) -> (i32, i32) {
    %c0_i32 = arith.constant 0 : i32
    %c0_i32_0 = arith.constant 0 : i32
    %c0_i32_1 = arith.constant 0 : i32
    return %c0_i32, %c0_i32_0 : i32, i32
  }
  func.func @transform_4(%arg0: i32, %arg1: i32) -> (i32, i32) {
    %c0_i32 = arith.constant 0 : i32
    %c0_i32_0 = arith.constant 0 : i32
    %c0_i32_1 = arith.constant 0 : i32
    return %c0_i32, %c0_i32_0 : i32, i32
  }
  func.func @transform_5(%arg0: i32, %arg1: i32) -> (i32, i32, i32) {
    %c0_i32 = arith.constant 0 : i32
    %c0_i32_0 = arith.constant 0 : i32
    return %arg0, %arg1, %c0_i32 : i32, i32, i32
  }
  func.func @transform_6(%arg0: i32, %arg1: i32) -> (i32, i32, i32) {
    %c0_i32 = arith.constant 0 : i32
    %c0_i32_0 = arith.constant 0 : i32
    return %arg0, %arg1, %c0_i32 : i32, i32, i32
  }
}

</mosaic_0001>

<bundles_post_ra>
// kernel: tpu_custom_call.1
= control target key start
LH: loop header
LB: loop body
LE: loop exit
PB: predicated region body
PF: predicated region fallthrough
CT: control target
= control target key end

     0   :  { %s1087_s0 = inlined_call_operand.hbm [shape: f32[2,8,32], index: 0, kind: input, shape index: {}]   ;;  %s1088_s1 = inlined_call_operand.hbm [shape: bf16[32,64], index: 1, kind: input, shape index: {}]   ;;  %s1089_s2 = inlined_call_operand.vmem [shape: f32[1,64], index: 2, kind: input, shape index: {}]   ;;  %s1090_s3 = inlined_call_operand.vmem [shape: f32[1,32], index: 3, kind: input, shape index: {}]   ;;  %s1091_s4 = inlined_call_operand.vmem [shape: f32[1,32], index: 4, kind: input, shape index: {}]   ;;  %s1092_s5 = inlined_call_operand.hbm [shape: bf16[2,8,32], index: 5, kind: output, shape index: {0}]   ;;  %s1093_s6 = inlined_call_operand.hbm [shape: bf16[2,8,32], index: 6, kind: output, shape index: {1}]  }
   0x1   :  { %1094 = sst [smem:[#allocation14_spill]] %s1088_s1 }
   0x2   :  { %12 = vsyncpa [#allocation3], 0 }
   0x3   :  { %14 = vsyncpa [#allocation3 + $0x1], 0 }
   0x4   :  { %15 = vsyncpa [#allocation6], 0 }
   0x5   :  { %16 = vsyncpa [#allocation4], 0 }
   0x6   :  { %18 = vsyncpa [#allocation4 + $0x1], 0 }
   0x7   :  { %19 = vsyncpa [#allocation9], 0 }
   0x8   :  { %21 = vsyncpa [#allocation9 + $0x1], 0  ;;  %s907_s21 = smov 0   ;;  %s909_s22 = smov 0  }
   0x9   :  { %s911_s23 = smov 0   ;;  %s913_s24 = smov 0  }
   0xa   :  { %s915_s25 = smov 0   ;;  %s917_s26 = smov 0  }
   0xb LB: > { %s567_s27 = sadd.s32 4294967295, %s865_s26   ;;  %p569_p0 = scmp.ge.s32.totalorder %s865_s26, 1  ;;  %s865_s26 = sphi %s917_s26, %s27_s26   ;;  %s861_s25 = sphi %s915_s25, %s1106_s25   ;;  %s857_s24 = sphi %s913_s24, %s1105_s24   ;;  %s853_s23 = sphi %s911_s23, %s1104_s23   ;;  %s849_s22 = sphi %s909_s22, %s1103_s22   ;;  %s845_s21 = sphi %s907_s21, %s1102_s21  }
   0xc   : > { %p939_p1 = scmp.eq.s32.totalorder %s567_s27, 0  ;;  %p212_p2 = scmp.lt.s32.totalorder %s865_s26, 3 }
   0xd   : > { %s1096_s1 = sld [smem:[#allocation14_spill]]  ;;  %s867_s9 = smov [#allocation5]  }
   0xe   : > { %p947_p3 = pnand %p569_p0, %p212_p2  ;;  %s225_s10 = sshll.u32 %s867_s9, 4  ;;  %s226_s10 = int_to_ptr.vmem [resolvable:$true] %s225_s10 }
   0xf   : > { %p571_p6 = scmp.ge.s32.totalorder %s865_s26, 2  ;;  %s868_s11 = smov 64  }
  0x10   : > { %p606_p4 = pneg %p947_p3  ;;  %s869_s12 = smov 4  }
  0x11   : > { %s568_s13 = sadd.s32 4294967294, %s865_s26   ;;  %s39_s14 = sadd.s32 1, %s861_s25 }
  0x12   : > { %p607_p5 = pnand %p606_p4, %p939_p1  ;;  %s48_s15 = sadd.s32 1, %s853_s23 }
  0x13   : > { %s223_s7 = sshll.u32 %s1096_s1, 4  ;;  %p41_p7 = scmp.ge.s32.totalorder %s39_s14, 2  ;;  %s224_s7 = int_to_ptr.hbm [resolvable:$true] %s223_s7 }
  0x14   : > { %609 = dma.hbm_to_vmem [thread:$0]  (!%p607_p5), %s224_s7, 256, %s226_s10, [#allocation6], %s868_s11, %s868_s11, %s869_s12  }
  0x15   : > { %p55_p8 = scmp.ne.s32.totalorder %s853_s23, %s849_s22  ;;  %p56_p9 = scmp.eq.s32.totalorder %s865_s26, 0 }
  0x16   : > { %p61_p10 = scmp.ne.s32.totalorder %s849_s22, %s845_s21  ;;  %s1108_s14 = smov (%p41_p7, %s39_s14), 0 }
  0x17   : > { %p966_p11 = por %p56_p9, %p55_p8  ;;  %s43_s18 = ssub.s32 %s861_s25, %s1108_s14 }
  0x18   : > { %p972_p12 = por %p939_p1, %p61_p10  ;;  %p171_p13 = scmp.eq.s32.totalorder %s567_s27, 1 }
  0x19   : > { %p46_p0 = scmp.eq.s32.totalorder %s43_s18, 0  ;;  %p177_p2 = scmp.eq.s32.totalorder %s568_s13, 1 }
  0x1a   : > { %p978_p4 = por %p171_p13, %p55_p8  ;;  %p622_p5 = scmp.lt.s32.totalorder %s865_s26, 2 }
  0x1b   : > { %s984_s20 = scalar_select %p46_p0, %s853_s23, %s48_s15  }
  0x1c   : > { %p986_p7 = por %p177_p2, %p61_p10  ;;  %s248_s30 = sand.u32 1, %s853_s23  }
  0x1d   : > { %s572_s7 = sshll.u32 %s248_s30, 3  ;;  %s573_s9 = sshll.u32 %s861_s25, 3 }
  0x1e   : > { %s257_s27 = scalar_lea.hbm %s1087_s0, %s573_s9  ;;  %s252_s12 = scalar_lea.vmem [#allocation2], %s572_s7 }
  0x1f   : > { %s261_s13 = sshll.u32 %s252_s12, 4  ;;  %s259_s18 = sshll.u32 %s257_s27, 4  ;;  %s262_s13 = int_to_ptr.vmem [resolvable:$true] %s261_s13  ;;  %s260_s18 = int_to_ptr.hbm [resolvable:$true] %s259_s18 }
  0x20   : > { %p611_p8 = pnand %p622_p5, %p966_p11  ;;  %s249_s15 = scalar_lea.sflag [#allocation3], %s248_s30 }
  0x21   : > { %270 = sbr.rel (%p947_p3) target bundleno = 568 (0x238), region = 40  ;;  %s1000_s1 = sand.u32 (!%p947_p3), 1, %s849_s22  }
  0x22   : > { %613 = dma.hbm_to_vmem [thread:$0]  (!%p611_p8), %s260_s18, 128, %s262_s13, %s249_s15  }
  0x23   : > { %s575_s10 = sshll.u32 (!%p947_p3), %s1000_s1, 3  ;;  %s273_s9 = scalar_lea.sflag (!%p947_p3), [#allocation3], %s1000_s1 }
  0x24   : > { %s276_s7 = scalar_lea.vmem (!%p947_p3), [#allocation2], %s575_s10 }
  0x26   : > { %828 = dma.done.wait (%p972_p12), %s273_s9, 128  }
  0x27   : > { %830 = vsyncadd (%p972_p12), %s273_s9, 4294967168 }
  0x28   : > { %832 = dma.done.wait (%p939_p1), [#allocation6], 256  }
  0x29   : > { %834 = vsyncadd (%p939_p1), [#allocation6], 4294967040  ;;  %vm320_vm0 = vcmask 261120   ;;  %v317_v0 = vld [vmem:[%s276_s7] sm:$0xff]  ;;  %v870_v2 = vmov 32.0   ;;  %v595_v14 = vld [vmem:[#allocation5 + $0x8] sm:$0xff] }
  0x2a   : > { %v321_v1 = vsel %vm320_vm0, %v317_v0, 0.0  ;;  %681 = vrcp.f32 %v870_v2  ;;  %391 = vmatpush.bf16.msra.mxu0 %v595_v14  ;;  %v594_v15 = vld [vmem:[#allocation5] sm:$0xff]  ;;  %v678_v29 = vld [vmem:[%s1090_s3] ss:$0 sm:$0xff]  ;;  %s590_s30 = sshll.u32 %s857_s24, 2  ;;  %s577_s11 = sshll.u32 %s1000_s1, 2 }
  0x2b   : > { %322 = vadd.xlane.f32.xlu0 %v321_v1  ;;  %v679_v31 = vld [vmem:[%s1091_s4] ss:$0 sm:$0xff]  ;;  %s423_s15 = scalar_lea.hbm %s1092_s5, %s590_s30  ;;  %s308_s10 = scalar_lea.vmem [#allocation7], %s577_s11  ;;  %vm399_vm4 = vcmask 257024  }
  0x2c   : > { %v680_v36 = vld [vmem:[%s1089_s2] ss:$0 sm:$0xff]  ;;  %s425_s9 = sshll.u32 %s308_s10, 4  ;;  %s427_s7 = sshll.u32 %s423_s15, 4  ;;  %s426_s9 = int_to_ptr.vmem [resolvable:$true] %s425_s9  ;;  %s428_s7 = int_to_ptr.hbm [resolvable:$true] %s427_s7 }
  0x2d   : > { %s871_s28 = smov 96   ;;  %s407_s8 = scalar_lea.sflag [#allocation4], %s1000_s1 }
  0x2e   : > { %392 = vmatpush.bf16.msra.mxu0 %v594_v15  ;;  %s761_s16 = sshra.s32 %s428_s7, 4  ;;  %s767_s13 = scalar_lea.hbm %s1092_s5, 8  ;;  %s762_s16 = int_to_ptr.hbm [resolvable:$true] %s761_s16 }
  0x2f   : > { %s763_s17 = scalar_lea.hbm %s762_s16, 4  ;;  %p768_p10 = scmp.lt.s32.totalorder %s762_s16, %s1092_s5 }
  0x30   : > { %v682_v3 = vpop.eup %681  ;;  %p764_p1 = scmp.ne.s32.totalorder %s762_s16, %s763_s17  ;;  %p769_p11 = scmp.lt.s32.totalorder %s767_s13, %s763_s17 }
  0x31   : > { %v325_v4 = vmul.f32 32.0, %v682_v3  ;;  %vm329_vm1 = vweird.f32 %v682_v3 }
  0x32   : > { %p765_p3 = pnand %p764_p1, %p978_p4  ;;  %p770_p12 = por %p769_p11, %p768_p10 }
  0x33   : > { %v326_v5 = vsub.f32 1.0, %v325_v4 }
  0x34   : > { %p766_p9 = pneg %p765_p3 }
  0x35   : > { %v327_v6 = vmul.f32 %v682_v3, %v326_v5 }
  0x36   : > { %p771_p13 = pnand %p770_p12, %p766_p9 }
  0x37   : > { %v328_v7 = vadd.f32 %v682_v3, %v327_v6 }
  0x39   : > { %v330_v8 = vsel %vm329_vm1, %v682_v3, %v328_v7 }
  0x9e   : > { %v323_v9 = vpop.xlane.xlu0 %322 }
  0x9f   : > { %v331_v10 = vmul.f32 %v330_v8, %v323_v9 }
  0xa1   : > { %v332_v11 = vsub.f32 %v317_v0, %v331_v10 }
  0xa3   : > { %v333_v12 = vmul.f32 %v332_v11, %v332_v11  ;;  %v355_v30 = vmul.f32 %v678_v29, %v332_v11 }
  0xa5   : > { %v334_v13 = vsel %vm320_vm0, %v333_v12, 0.0 }
  0xa6   : > { %335 = vadd.xlane.f32.xlu0 %v334_v13 }
 0x119   : > { %v336_v16 = vpop.xlane.xlu0 %335 }
 0x11a   : > { %v337_v17 = vmul.f32 0.032258064, %v336_v16 }
 0x11c   : > { %683 = vrsqrt.f32 %v337_v17  ;;  %vm345_vm2 = vcmp.eq.f32.partialorder %v337_v17, inf  ;;  %v348_v25 = vand.u32 2147483648, %v337_v17  ;;  %vm347_vm3 = vcmp.eq.f32.partialorder %v337_v17, 0.0 }
 0x122   : > { %v684_v18 = vpop.eup %683 }
 0x123   : > { %v339_v19 = vmul.f32 %v684_v18, %v337_v17 }
 0x125   : > { %v340_v20 = vmul.f32 %v684_v18, %v339_v19 }
 0x127   : > { %v341_v21 = vmul.f32 0.5, %v340_v20 }
 0x129   : > { %v342_v22 = vsub.f32 1.5, %v341_v21 }
 0x12b   : > { %v343_v23 = vmul.f32 %v684_v18, %v342_v22 }
 0x12d   : > { %v344_v24 = vmul.f32 %v343_v23, %v337_v17 }
 0x12f   : > { %v346_v26 = vsel %vm345_vm2, %v337_v17, %v344_v24 }
 0x130   : > { %v349_v27 = vsel %vm347_vm3, %v348_v25, %v346_v26 }
 0x131   : > { %v350_v28 = vadd.f32 1e-06, %v349_v27 }
 0x133   : > { %685 = vrcp.f32 %v350_v28 }
 0x139   : > { %v686_v32 = vpop.eup %685 }
 0x13a   : > { %v356_v33 = vmul.f32 %v686_v32, %v355_v30 }
 0x13c   : > { %v360_v34 = vadd.f32 %v679_v31, %v356_v33 }
 0x13e   : > { %v361_v35 = vpack.c.bf16 %v360_v34, %v360_v34 }
 0x140   : > { %587 = vmatmul.msk.bf16.vlgmr.msra.gmra.mxu0 %vm320_vm0, %v361_v35 }
 0x1bd   : > { %v394_v37 = vpop.f32.mrf.mxu0 }
 0x1be   : > { %v395_v38 = vadd.f32 %v680_v36, %v394_v37 }
 0x1c0   : > { %v398_v39 = vpack.c.bf16 %v395_v38, %v395_v38 }
 0x1c2   : > { %402 = vrot.lane.b32.xlu1 %v398_v39, %s871_s28  ;;  %400 = vst.msk [vmem:[%s308_s10] sm:$0xf] %vm399_vm4, %v398_v39 }
 0x1c3   : > { %774 = shalt.err (!%p771_p13)
}
 0x1c4   : > { %602 = dma.vmem_to_hbm [thread:$0]  (%p978_p4), %s426_s9, 64, %s428_s7, %s407_s8  }
 0x1c5   : > { %v396_v40 = vpop.f32.mrf.mxu0  ;;  %s438_s27 = scalar_lea.hbm %s1093_s6, %s590_s30  ;;  %s315_s12 = scalar_lea.vmem [#allocation8], %s577_s11 }
 0x1c6   : > { %s440_s16 = sshll.u32 %s315_s12, 4  ;;  %s442_s17 = sshll.u32 %s438_s27, 4  ;;  %s441_s16 = int_to_ptr.vmem [resolvable:$true] %s440_s16  ;;  %s443_s17 = int_to_ptr.hbm [resolvable:$true] %s442_s17 }
 0x1c7   : > { %s412_s13 = scalar_lea.sflag [#allocation9], %s1000_s1  ;;  %s789_s18 = sshra.s32 %s443_s17, 4  ;;  %s790_s18 = int_to_ptr.hbm [resolvable:$true] %s789_s18 }
 0x1c8   : > { %s791_s15 = scalar_lea.hbm %s790_s18, 4  ;;  %s795_s30 = scalar_lea.hbm %s1093_s6, 8 }
 0x1c9   : > { %p792_p0 = scmp.ne.s32.totalorder %s790_s18, %s791_s15  ;;  %p796_p8 = scmp.lt.s32.totalorder %s790_s18, %s1093_s6 }
 0x1ca   : > { %p797_p1 = scmp.lt.s32.totalorder %s795_s30, %s791_s15 }
 0x1cb   : > { %p793_p2 = pnand %p792_p0, %p978_p4 }
 0x1cc   : > { %p798_p3 = por %p797_p1, %p796_p8 }
 0x1cd   : > { %p794_p5 = pneg %p793_p2 }
 0x1cf   : > { %p799_p9 = pnand %p798_p3, %p794_p5 }
 0x234   : > { %v403_v41 = vpop.permute.xlu1 %402 }
 0x235   : > { %405 = vst.msk [vmem:[%s315_s12] sm:$0xf] %vm399_vm4, %v403_v41 }
 0x236   : > { %802 = shalt.err (!%p799_p9)
}
 0x237   : > { %603 = dma.vmem_to_hbm [thread:$0]  (%p978_p4), %s441_s16, 64, %s443_s17, %s412_s13  }
 0x238 PF: > { %s454_s1 = sand.u32 1, %s845_s21   ;;  %p615_p10 = pnand %p571_p6, %p986_p7 }
 0x239   : > { %s455_s8 = scalar_lea.sflag [#allocation4], %s454_s1 }
 0x23a   : > { %p616_p11 = pneg %p615_p10 }
 0x23c   : > { %836 = dma.done.wait (%p616_p11), %s455_s8, 64  }
 0x23d   : > { %838 = vsyncadd (%p616_p11), %s455_s8, 4294967232  ;;  %s465_s10 = scalar_lea.sflag [#allocation9], %s454_s1 }
 0x23e   : > { %840 = dma.done.wait (%p616_p11), %s465_s10, 64  }
 0x23f   : > { %842 = vsyncadd (%p616_p11), %s465_s10, 4294967232  ;;  %s27_s26 = sadd.s32 1, %s865_s26   ;;  %s1102_s21 = smov %s849_s22 }
 0x240   : > { %p24_p12 = scmp.ge.s32.totalorder %s27_s26, 4   ;;  %s1103_s22 = smov %s853_s23 }
 0x241   : > { %s1104_s23 = smov %s984_s20  ;;  %s1105_s24 = smov %s861_s25 }
 0x242   : > { %s1106_s25 = smov %s1108_s14  ;;  %26 = sbr.rel (!%p24_p12) target bundleno = 11 (0xb), region = 106 }
 0x247   :  { %471 = vsyncpa [#allocation3], 1 }
 0x248   :  { %473 = vsyncpa [#allocation3 + $0x1], 1 }
 0x249   :  { %474 = vsyncpa [#allocation6], 1 }
 0x24a   :  { %475 = vsyncpa [#allocation4], 1 }
 0x24b   :  { %477 = vsyncpa [#allocation4 + $0x1], 1 }
 0x24c   :  { %478 = vsyncpa [#allocation9], 1 }
 0x24d   :  { %480 = vsyncpa [#allocation9 + $0x1], 1 }

</bundles_post_ra>
